<compile_context>
chip_gen: v6e
topology: v6e:2x2x1
jax: 0.10.0
libtpu: 0.0.40
codegen_flags: <defaults>
</compile_context>

<pallas_src>
import jax
import jax.numpy as jnp
from jax.experimental import pallas as pl
from jax.experimental.pallas import tpu as pltpu


def lstm_recurrence_kernel(pg_ref, w_hh_t_ref, out_ref, h_ref, c_ref):
    """One time-chunk of the LSTM recurrence.

    pg_ref    : (Tc, Bp, 4H)  pre-computed input pre-gates (x@W_ih^T + b),
                              g-gate columns pre-scaled by 2
    w_hh_t_ref: (H, 4H)       hidden->gates weights (transposed, g cols x2)
    out_ref   : (Tc, Bp, H)   per-step hidden states for this chunk
    h_ref     : (Bp, H)       scratch: h carried across chunks
    c_ref     : (Bp, H)       scratch: c carried across chunks
    """
    Tc = pg_ref.shape[0]
    H = w_hh_t_ref.shape[0]

    # Zero initial state on the first time chunk (h0 = c0 = 0).
    @pl.when(pl.program_id(0) == 0)
    def _():
        h_ref[...] = jnp.zeros_like(h_ref)
        c_ref[...] = jnp.zeros_like(c_ref)

    # Keep the recurrence weight resident as a value (4 vregs for H=32).
    w_hh_t = w_hh_t_ref[...]

    def step(t, carry):
        h, c = carry
        gates = pg_ref[t] + jnp.dot(h, w_hh_t,
                                    preferred_element_type=jnp.float32)
        # Single full-vreg EUP launch: sigmoid covers i, f, o directly and
        # the (pre-scaled) g gate via tanh(z) = 2*sigmoid(2z) - 1.
        sig = jax.nn.sigmoid(gates)
        # PyTorch gate ordering: i, f, g, o
        i_g = sig[:, 0:H]
        f_g = sig[:, H:2 * H]
        g_g = 2.0 * sig[:, 2 * H:3 * H] - 1.0
        o_g = sig[:, 3 * H:4 * H]
        c_new = f_g * c + i_g * g_g
        h_new = o_g * jnp.tanh(c_new)
        out_ref[t] = h_new
        return h_new, c_new

    h_fin, c_fin = jax.lax.fori_loop(
        0, Tc, step, (h_ref[...], c_ref[...]), unroll=min(8, Tc))
    h_ref[...] = h_fin
    c_ref[...] = c_fin


def lstm_pinn_forward(params, current, times, initial_voltage, *, t_chunk=512):
    """Mirrors LSTMPINNBatteryModel.forward (num_layers=1, h0 = c0 = 0)."""
    current = current.astype(jnp.float32)
    times = times.astype(jnp.float32)
    iv = initial_voltage.astype(jnp.float32)
    if current.ndim == 2:
        current = current[..., None]
    if times.ndim == 2:
        times = times[..., None]
    if iv.ndim == 1:
        iv = iv[:, None]
    B, T = current.shape[0], current.shape[1]
    iv_exp = jnp.broadcast_to(iv[:, None, :], (B, T, 1))
    x = jnp.concatenate([current, times, iv_exp], axis=2)        # (B, T, 3)

    w_ih, w_hh = params["w_ih"], params["w_hh"]
    b_ih, b_hh = params["b_ih"], params["b_hh"]
    w_fc, b_fc = params["w_fc"], params["b_fc"]
    H = w_hh.shape[1]

    # Pre-scale the g-gate rows by 2 so the kernel only needs sigmoid(gates).
    gate_scale = jnp.ones((4 * H,), jnp.float32).at[2 * H:3 * H].set(2.0)
    w_ih_s = w_ih * gate_scale[:, None]                          # (4H, 3)
    w_hh_s = w_hh * gate_scale[:, None]                          # (4H, H)
    b_s = (b_ih + b_hh) * gate_scale                             # (4H,)

    # Hoisted input projection (XLA): lane-dense (B, T, 4H) pre-gates.
    pg = jnp.einsum("btf,gf->btg", x, w_ih_s) + b_s              # (B, T, 4H)

    # Pad batch to a multiple of 8 (sublane) and time to a multiple of the
    # chunk.  Padded entries have zero pre-gates: batch-pad rows are
    # independent and sliced off; trailing time-pad steps only contaminate
    # later all-padding chunks.
    Bp = max(8, ((B + 7) // 8) * 8)
    Tc = min(t_chunk, T)
    Tp = ((T + Tc - 1) // Tc) * Tc
    pg = jnp.pad(pg, ((0, Bp - B), (0, Tp - T), (0, 0)))
    pg_tm = jnp.transpose(pg, (1, 0, 2))                         # (Tp, Bp, 4H)

    grid = (Tp // Tc,)
    hseq_tm = pl.pallas_call(
        lstm_recurrence_kernel,
        out_shape=jax.ShapeDtypeStruct((Tp, Bp, H), jnp.float32),
        grid_spec=pltpu.PrefetchScalarGridSpec(
            num_scalar_prefetch=0,
            grid=grid,
            in_specs=[
                pl.BlockSpec((Tc, Bp, 4 * H), lambda t: (t, 0, 0)),  # pre-gates
                pl.BlockSpec((H, 4 * H), lambda t: (0, 0)),          # W_hh^T
            ],
            out_specs=pl.BlockSpec((Tc, Bp, H), lambda t: (t, 0, 0)),
            scratch_shapes=[
                pltpu.VMEM((Bp, H), jnp.float32),          # h carry
                pltpu.VMEM((Bp, H), jnp.float32),          # c carry
            ]),
        compiler_params=pltpu.CompilerParams(
            dimension_semantics=("arbitrary",),
            vmem_limit_bytes=48 * 1024 * 1024),
    )(pg_tm, w_hh_s.T)

    # Hoisted FC projection (XLA): one (B*T, H) x (H, O) matmul.
    hseq = jnp.transpose(hseq_tm, (1, 0, 2))[:B, :T]             # (B, T, H)
    return hseq @ w_fc.T + b_fc                                  # (B, T, O)


def reference_forward(params, current, times, initial_voltage):
    """Pure-JAX reference (lax.scan) for correctness checking."""
    current = current[..., None].astype(jnp.float32)
    times = times[..., None].astype(jnp.float32)
    iv = initial_voltage[:, None].astype(jnp.float32)
    B, T = current.shape[0], current.shape[1]
    x = jnp.concatenate(
        [current, times, jnp.broadcast_to(iv[:, None, :], (B, T, 1))], axis=2)
    H = params["w_hh"].shape[1]

    def step(carry, x_t):
        h, c = carry
        gates = (x_t @ params["w_ih"].T + params["b_ih"]
                 + h @ params["w_hh"].T + params["b_hh"])
        i_g = jax.nn.sigmoid(gates[:, 0:H])
        f_g = jax.nn.sigmoid(gates[:, H:2 * H])
        g_g = jnp.tanh(gates[:, 2 * H:3 * H])
        o_g = jax.nn.sigmoid(gates[:, 3 * H:4 * H])
        c_new = f_g * c + i_g * g_g
        h_new = o_g * jnp.tanh(c_new)
        return (h_new, c_new), h_new

    h0 = jnp.zeros((B, H), jnp.float32)
    _, hs = jax.lax.scan(step, (h0, h0), jnp.transpose(x, (1, 0, 2)))
    hs = jnp.transpose(hs, (1, 0, 2))                            # (B, T, H)
    return hs @ params["w_fc"].T + params["b_fc"]


def init_params(key, hidden_size, output_size):
    ks = jax.random.split(key, 6)
    k = 1.0 / jnp.sqrt(hidden_size)
    u = lambda kk, shape: jax.random.uniform(kk, shape, jnp.float32, -k, k)
    return {
        "w_ih": u(ks[0], (4 * hidden_size, 3)),
        "w_hh": u(ks[1], (4 * hidden_size, hidden_size)),
        "b_ih": u(ks[2], (4 * hidden_size,)),
        "b_hh": u(ks[3], (4 * hidden_size,)),
        "w_fc": u(ks[4], (output_size, hidden_size)),
        "b_fc": u(ks[5], (output_size,)),
    }


if __name__ == "__main__":
    B, T, H, O = 2, 8, 32, 1
    key = jax.random.PRNGKey(0)
    kp, k1, k2, k3 = jax.random.split(key, 4)

    params = init_params(kp, H, O)
    current = jax.random.normal(k1, (B, T), jnp.float32)
    times = jax.random.uniform(k2, (B, T), jnp.float32)
    initial_voltage = 3.7 + 0.1 * jax.random.normal(k3, (B,), jnp.float32)

    out = lstm_pinn_forward(params, current, times, initial_voltage)
    out = jax.block_until_ready(out)
    ref = reference_forward(params, current, times, initial_voltage)
    assert out.shape == (B, T, O), out.shape
    # Slightly looser tolerance: tanh(z)=2*sigmoid(2z)-1 fold differs by float
    # rounding from jnp.tanh and the error compounds through the recurrence.
    assert jnp.allclose(out, ref, atol=1e-4, rtol=1e-4), "mismatch vs reference"

    # Exercise the multi-chunk grid path (T=20 with chunk 8 -> grid of 3,
    # time padding + h/c carry across chunks).
    T2 = 20
    current2 = jax.random.normal(k1, (B, T2), jnp.float32)
    times2 = jax.random.uniform(k2, (B, T2), jnp.float32)
    out2 = lstm_pinn_forward(params, current2, times2, initial_voltage,
                             t_chunk=8)
    out2 = jax.block_until_ready(out2)
    ref2 = reference_forward(params, current2, times2, initial_voltage)
    assert out2.shape == (B, T2, O), out2.shape
    assert jnp.allclose(out2, ref2, atol=1e-4, rtol=1e-4), "mismatch (chunked)"

    print("KERNEL_OK")
</pallas_src>

<mosaic_0001>
module attributes {stable_mosaic.version = 11 : i64} {
  func.func @lstm_recurrence_kernel(%arg0: i32, %arg1: memref<8x8x128xf32, #tpu.memory_space<vmem>>, %arg2: memref<32x128xf32, #tpu.memory_space<vmem>>, %arg3: memref<8x8x32xf32, #tpu.memory_space<vmem>>, %arg4: memref<8x32xf32, #tpu.memory_space<vmem>>, %arg5: memref<8x32xf32, #tpu.memory_space<vmem>>) attributes {dimension_semantics = [#tpu.dimension_semantics<arbitrary>], iteration_bounds = array<i64: 1>, scalar_prefetch = 0 : i64, scratch_operands = 2 : i64, tpu.core_type = #tpu.core_type<tc>, window_params = [{transform_indices = @transform_0, window_bounds = array<i64: 8, 8, 128>}, {pipeline_mode = #tpu.pipeline_mode<synchronous>, transform_indices = @transform_1, window_bounds = array<i64: 32, 128>}, {transform_indices = @transform_2, window_bounds = array<i64: 8, 8, 32>}]} {
    %c0_i32 = arith.constant 0 : i32
    %0 = arith.cmpi eq, %arg0, %c0_i32 : i32
    %1 = arith.extui %0 : i1 to i32
    %c0_i32_0 = arith.constant 0 : i32
    %2 = arith.cmpi ne, %1, %c0_i32_0 : i32
    scf.if %2 {
      %cst_74 = arith.constant 0.000000e+00 : f32
      %224 = vector.broadcast %cst_74 : f32 to vector<8x32xf32>
      %c0_75 = arith.constant 0 : index
      %c0_76 = arith.constant 0 : index
      %225 = vector.load %arg4[%c0_75, %c0_76] : memref<8x32xf32, #tpu.memory_space<vmem>>, vector<8x32xf32>
      tpu.vector_store %arg4[%c0_75, %c0_76], %224 {strides = array<i32>} : memref<8x32xf32, #tpu.memory_space<vmem>>, vector<8x32xf32>,
      %cst_77 = arith.constant 0.000000e+00 : f32
      %226 = vector.broadcast %cst_77 : f32 to vector<8x32xf32>
      %c0_78 = arith.constant 0 : index
      %c0_79 = arith.constant 0 : index
      %227 = vector.load %arg5[%c0_78, %c0_79] : memref<8x32xf32, #tpu.memory_space<vmem>>, vector<8x32xf32>
      tpu.vector_store %arg5[%c0_78, %c0_79], %226 {strides = array<i32>} : memref<8x32xf32, #tpu.memory_space<vmem>>, vector<8x32xf32>,
    } else {
    }
    %c0 = arith.constant 0 : index
    %c0_1 = arith.constant 0 : index
    %3 = vector.load %arg2[%c0, %c0_1] : memref<32x128xf32, #tpu.memory_space<vmem>>, vector<32x128xf32>
    %c0_2 = arith.constant 0 : index
    %c0_3 = arith.constant 0 : index
    %4 = vector.load %arg4[%c0_2, %c0_3] : memref<8x32xf32, #tpu.memory_space<vmem>>, vector<8x32xf32>
    %c0_4 = arith.constant 0 : index
    %c0_5 = arith.constant 0 : index
    %5 = vector.load %arg5[%c0_4, %c0_5] : memref<8x32xf32, #tpu.memory_space<vmem>>, vector<8x32xf32>
    %c0_i32_6 = arith.constant 0 : i32
    %6 = arith.index_cast %c0_i32_6 : i32 to index
    %c0_7 = arith.constant 0 : index
    %c0_8 = arith.constant 0 : index
    %7 = vector.load %arg1[%6, %c0_7, %c0_8] : memref<8x8x128xf32, #tpu.memory_space<vmem>>, vector<1x8x128xf32>
    %8 = vector.shape_cast %7 : vector<1x8x128xf32> to vector<8x128xf32>
    %cst = arith.constant dense<0.000000e+00> : vector<8x128xf32>
    %9 = tpu.matmul %4, %3, %cst {dimension_numbers = #tpu.dot_dimension_numbers<[1], [0], [0], [1], [0, 0, 1, 1], [], []>} : vector<8x32xf32>, vector<32x128xf32>, vector<8x128xf32> -> vector<8x128xf32>
    %10 = arith.addf %8, %9 : vector<8x128xf32>
    %11 = arith.negf %10 : vector<8x128xf32>
    %12 = math.exp %11 : vector<8x128xf32>
    %cst_9 = arith.constant 1.000000e+00 : f32
    %13 = vector.broadcast %cst_9 : f32 to vector<8x128xf32>
    %14 = arith.addf %13, %12 : vector<8x128xf32>
    %15 = arith.divf %13, %14 : vector<8x128xf32>
    %16 = vector.extract_strided_slice %15 {offsets = [0, 0], sizes = [8, 32], strides = [1, 1]} : vector<8x128xf32> to vector<8x32xf32>
    %17 = vector.extract_strided_slice %15 {offsets = [0, 32], sizes = [8, 32], strides = [1, 1]} : vector<8x128xf32> to vector<8x32xf32>
    %18 = vector.extract_strided_slice %15 {offsets = [0, 64], sizes = [8, 32], strides = [1, 1]} : vector<8x128xf32> to vector<8x32xf32>
    %cst_10 = arith.constant 2.000000e+00 : f32
    %19 = vector.broadcast %cst_10 : f32 to vector<8x32xf32>
    %20 = arith.mulf %19, %18 : vector<8x32xf32>
    %cst_11 = arith.constant 1.000000e+00 : f32
    %21 = vector.broadcast %cst_11 : f32 to vector<8x32xf32>
    %22 = arith.subf %20, %21 : vector<8x32xf32>
    %23 = vector.extract_strided_slice %15 {offsets = [0, 96], sizes = [8, 32], strides = [1, 1]} : vector<8x128xf32> to vector<8x32xf32>
    %24 = arith.mulf %17, %5 : vector<8x32xf32>
    %25 = arith.mulf %16, %22 : vector<8x32xf32>
    %26 = arith.addf %24, %25 : vector<8x32xf32>
    %27 = math.tanh %26 : vector<8x32xf32>
    %28 = arith.mulf %23, %27 : vector<8x32xf32>
    %29 = arith.index_cast %c0_i32_6 : i32 to index
    %c0_12 = arith.constant 0 : index
    %c0_13 = arith.constant 0 : index
    %30 = vector.load %arg3[%29, %c0_12, %c0_13] : memref<8x8x32xf32, #tpu.memory_space<vmem>>, vector<1x8x32xf32>
    %31 = vector.shape_cast %30 : vector<1x8x32xf32> to vector<8x32xf32>
    %32 = vector.shape_cast %28 : vector<8x32xf32> to vector<1x8x32xf32>
    tpu.vector_store %arg3[%29, %c0_12, %c0_13], %32 {strides = array<i32>} : memref<8x8x32xf32, #tpu.memory_space<vmem>>, vector<1x8x32xf32>,
    %c1_i32 = arith.constant 1 : i32
    %33 = arith.index_cast %c1_i32 : i32 to index
    %c0_14 = arith.constant 0 : index
    %c0_15 = arith.constant 0 : index
    %34 = vector.load %arg1[%33, %c0_14, %c0_15] : memref<8x8x128xf32, #tpu.memory_space<vmem>>, vector<1x8x128xf32>
    %35 = vector.shape_cast %34 : vector<1x8x128xf32> to vector<8x128xf32>
    %cst_16 = arith.constant dense<0.000000e+00> : vector<8x128xf32>
    %36 = tpu.matmul %28, %3, %cst_16 {dimension_numbers = #tpu.dot_dimension_numbers<[1], [0], [0], [1], [0, 0, 1, 1], [], []>} : vector<8x32xf32>, vector<32x128xf32>, vector<8x128xf32> -> vector<8x128xf32>
    %37 = arith.addf %35, %36 : vector<8x128xf32>
    %38 = arith.negf %37 : vector<8x128xf32>
    %39 = math.exp %38 : vector<8x128xf32>
    %cst_17 = arith.constant 1.000000e+00 : f32
    %40 = vector.broadcast %cst_17 : f32 to vector<8x128xf32>
    %41 = arith.addf %40, %39 : vector<8x128xf32>
    %42 = arith.divf %40, %41 : vector<8x128xf32>
    %43 = vector.extract_strided_slice %42 {offsets = [0, 0], sizes = [8, 32], strides = [1, 1]} : vector<8x128xf32> to vector<8x32xf32>
    %44 = vector.extract_strided_slice %42 {offsets = [0, 32], sizes = [8, 32], strides = [1, 1]} : vector<8x128xf32> to vector<8x32xf32>
    %45 = vector.extract_strided_slice %42 {offsets = [0, 64], sizes = [8, 32], strides = [1, 1]} : vector<8x128xf32> to vector<8x32xf32>
    %cst_18 = arith.constant 2.000000e+00 : f32
    %46 = vector.broadcast %cst_18 : f32 to vector<8x32xf32>
    %47 = arith.mulf %46, %45 : vector<8x32xf32>
    %cst_19 = arith.constant 1.000000e+00 : f32
    %48 = vector.broadcast %cst_19 : f32 to vector<8x32xf32>
    %49 = arith.subf %47, %48 : vector<8x32xf32>
    %50 = vector.extract_strided_slice %42 {offsets = [0, 96], sizes = [8, 32], strides = [1, 1]} : vector<8x128xf32> to vector<8x32xf32>
    %51 = arith.mulf %44, %26 : vector<8x32xf32>
    %52 = arith.mulf %43, %49 : vector<8x32xf32>
    %53 = arith.addf %51, %52 : vector<8x32xf32>
    %54 = math.tanh %53 : vector<8x32xf32>
    %55 = arith.mulf %50, %54 : vector<8x32xf32>
    %56 = arith.index_cast %c1_i32 : i32 to index
    %c0_20 = arith.constant 0 : index
    %c0_21 = arith.constant 0 : index
    %57 = vector.load %arg3[%56, %c0_20, %c0_21] : memref<8x8x32xf32, #tpu.memory_space<vmem>>, vector<1x8x32xf32>
    %58 = vector.shape_cast %57 : vector<1x8x32xf32> to vector<8x32xf32>
    %59 = vector.shape_cast %55 : vector<8x32xf32> to vector<1x8x32xf32>
    tpu.vector_store %arg3[%56, %c0_20, %c0_21], %59 {strides = array<i32>} : memref<8x8x32xf32, #tpu.memory_space<vmem>>, vector<1x8x32xf32>,
    %c2_i32 = arith.constant 2 : i32
    %60 = arith.index_cast %c2_i32 : i32 to index
    %c0_22 = arith.constant 0 : index
    %c0_23 = arith.constant 0 : index
    %61 = vector.load %arg1[%60, %c0_22, %c0_23] : memref<8x8x128xf32, #tpu.memory_space<vmem>>, vector<1x8x128xf32>
    %62 = vector.shape_cast %61 : vector<1x8x128xf32> to vector<8x128xf32>
    %cst_24 = arith.constant dense<0.000000e+00> : vector<8x128xf32>
    %63 = tpu.matmul %55, %3, %cst_24 {dimension_numbers = #tpu.dot_dimension_numbers<[1], [0], [0], [1], [0, 0, 1, 1], [], []>} : vector<8x32xf32>, vector<32x128xf32>, vector<8x128xf32> -> vector<8x128xf32>
    %64 = arith.addf %62, %63 : vector<8x128xf32>
    %65 = arith.negf %64 : vector<8x128xf32>
    %66 = math.exp %65 : vector<8x128xf32>
    %cst_25 = arith.constant 1.000000e+00 : f32
    %67 = vector.broadcast %cst_25 : f32 to vector<8x128xf32>
    %68 = arith.addf %67, %66 : vector<8x128xf32>
    %69 = arith.divf %67, %68 : vector<8x128xf32>
    %70 = vector.extract_strided_slice %69 {offsets = [0, 0], sizes = [8, 32], strides = [1, 1]} : vector<8x128xf32> to vector<8x32xf32>
    %71 = vector.extract_strided_slice %69 {offsets = [0, 32], sizes = [8, 32], strides = [1, 1]} : vector<8x128xf32> to vector<8x32xf32>
    %72 = vector.extract_strided_slice %69 {offsets = [0, 64], sizes = [8, 32], strides = [1, 1]} : vector<8x128xf32> to vector<8x32xf32>
    %cst_26 = arith.constant 2.000000e+00 : f32
    %73 = vector.broadcast %cst_26 : f32 to vector<8x32xf32>
    %74 = arith.mulf %73, %72 : vector<8x32xf32>
    %cst_27 = arith.constant 1.000000e+00 : f32
    %75 = vector.broadcast %cst_27 : f32 to vector<8x32xf32>
    %76 = arith.subf %74, %75 : vector<8x32xf32>
    %77 = vector.extract_strided_slice %69 {offsets = [0, 96], sizes = [8, 32], strides = [1, 1]} : vector<8x128xf32> to vector<8x32xf32>
    %78 = arith.mulf %71, %53 : vector<8x32xf32>
    %79 = arith.mulf %70, %76 : vector<8x32xf32>
    %80 = arith.addf %78, %79 : vector<8x32xf32>
    %81 = math.tanh %80 : vector<8x32xf32>
    %82 = arith.mulf %77, %81 : vector<8x32xf32>
    %83 = arith.index_cast %c2_i32 : i32 to index
    %c0_28 = arith.constant 0 : index
    %c0_29 = arith.constant 0 : index
    %84 = vector.load %arg3[%83, %c0_28, %c0_29] : memref<8x8x32xf32, #tpu.memory_space<vmem>>, vector<1x8x32xf32>
    %85 = vector.shape_cast %84 : vector<1x8x32xf32> to vector<8x32xf32>
    %86 = vector.shape_cast %82 : vector<8x32xf32> to vector<1x8x32xf32>
    tpu.vector_store %arg3[%83, %c0_28, %c0_29], %86 {strides = array<i32>} : memref<8x8x32xf32, #tpu.memory_space<vmem>>, vector<1x8x32xf32>,
    %c3_i32 = arith.constant 3 : i32
    %87 = arith.index_cast %c3_i32 : i32 to index
    %c0_30 = arith.constant 0 : index
    %c0_31 = arith.constant 0 : index
    %88 = vector.load %arg1[%87, %c0_30, %c0_31] : memref<8x8x128xf32, #tpu.memory_space<vmem>>, vector<1x8x128xf32>
    %89 = vector.shape_cast %88 : vector<1x8x128xf32> to vector<8x128xf32>
    %cst_32 = arith.constant dense<0.000000e+00> : vector<8x128xf32>
    %90 = tpu.matmul %82, %3, %cst_32 {dimension_numbers = #tpu.dot_dimension_numbers<[1], [0], [0], [1], [0, 0, 1, 1], [], []>} : vector<8x32xf32>, vector<32x128xf32>, vector<8x128xf32> -> vector<8x128xf32>
    %91 = arith.addf %89, %90 : vector<8x128xf32>
    %92 = arith.negf %91 : vector<8x128xf32>
    %93 = math.exp %92 : vector<8x128xf32>
    %cst_33 = arith.constant 1.000000e+00 : f32
    %94 = vector.broadcast %cst_33 : f32 to vector<8x128xf32>
    %95 = arith.addf %94, %93 : vector<8x128xf32>
    %96 = arith.divf %94, %95 : vector<8x128xf32>
    %97 = vector.extract_strided_slice %96 {offsets = [0, 0], sizes = [8, 32], strides = [1, 1]} : vector<8x128xf32> to vector<8x32xf32>
    %98 = vector.extract_strided_slice %96 {offsets = [0, 32], sizes = [8, 32], strides = [1, 1]} : vector<8x128xf32> to vector<8x32xf32>
    %99 = vector.extract_strided_slice %96 {offsets = [0, 64], sizes = [8, 32], strides = [1, 1]} : vector<8x128xf32> to vector<8x32xf32>
    %cst_34 = arith.constant 2.000000e+00 : f32
    %100 = vector.broadcast %cst_34 : f32 to vector<8x32xf32>
    %101 = arith.mulf %100, %99 : vector<8x32xf32>
    %cst_35 = arith.constant 1.000000e+00 : f32
    %102 = vector.broadcast %cst_35 : f32 to vector<8x32xf32>
    %103 = arith.subf %101, %102 : vector<8x32xf32>
    %104 = vector.extract_strided_slice %96 {offsets = [0, 96], sizes = [8, 32], strides = [1, 1]} : vector<8x128xf32> to vector<8x32xf32>
    %105 = arith.mulf %98, %80 : vector<8x32xf32>
    %106 = arith.mulf %97, %103 : vector<8x32xf32>
    %107 = arith.addf %105, %106 : vector<8x32xf32>
    %108 = math.tanh %107 : vector<8x32xf32>
    %109 = arith.mulf %104, %108 : vector<8x32xf32>
    %110 = arith.index_cast %c3_i32 : i32 to index
    %c0_36 = arith.constant 0 : index
    %c0_37 = arith.constant 0 : index
    %111 = vector.load %arg3[%110, %c0_36, %c0_37] : memref<8x8x32xf32, #tpu.memory_space<vmem>>, vector<1x8x32xf32>
    %112 = vector.shape_cast %111 : vector<1x8x32xf32> to vector<8x32xf32>
    %113 = vector.shape_cast %109 : vector<8x32xf32> to vector<1x8x32xf32>
    tpu.vector_store %arg3[%110, %c0_36, %c0_37], %113 {strides = array<i32>} : memref<8x8x32xf32, #tpu.memory_space<vmem>>, vector<1x8x32xf32>,
    %c4_i32 = arith.constant 4 : i32
    %114 = arith.index_cast %c4_i32 : i32 to index
    %c0_38 = arith.constant 0 : index
    %c0_39 = arith.constant 0 : index
    %115 = vector.load %arg1[%114, %c0_38, %c0_39] : memref<8x8x128xf32, #tpu.memory_space<vmem>>, vector<1x8x128xf32>
    %116 = vector.shape_cast %115 : vector<1x8x128xf32> to vector<8x128xf32>
    %cst_40 = arith.constant dense<0.000000e+00> : vector<8x128xf32>
    %117 = tpu.matmul %109, %3, %cst_40 {dimension_numbers = #tpu.dot_dimension_numbers<[1], [0], [0], [1], [0, 0, 1, 1], [], []>} : vector<8x32xf32>, vector<32x128xf32>, vector<8x128xf32> -> vector<8x128xf32>
    %118 = arith.addf %116, %117 : vector<8x128xf32>
    %119 = arith.negf %118 : vector<8x128xf32>
    %120 = math.exp %119 : vector<8x128xf32>
    %cst_41 = arith.constant 1.000000e+00 : f32
    %121 = vector.broadcast %cst_41 : f32 to vector<8x128xf32>
    %122 = arith.addf %121, %120 : vector<8x128xf32>
    %123 = arith.divf %121, %122 : vector<8x128xf32>
    %124 = vector.extract_strided_slice %123 {offsets = [0, 0], sizes = [8, 32], strides = [1, 1]} : vector<8x128xf32> to vector<8x32xf32>
    %125 = vector.extract_strided_slice %123 {offsets = [0, 32], sizes = [8, 32], strides = [1, 1]} : vector<8x128xf32> to vector<8x32xf32>
    %126 = vector.extract_strided_slice %123 {offsets = [0, 64], sizes = [8, 32], strides = [1, 1]} : vector<8x128xf32> to vector<8x32xf32>
    %cst_42 = arith.constant 2.000000e+00 : f32
    %127 = vector.broadcast %cst_42 : f32 to vector<8x32xf32>
    %128 = arith.mulf %127, %126 : vector<8x32xf32>
    %cst_43 = arith.constant 1.000000e+00 : f32
    %129 = vector.broadcast %cst_43 : f32 to vector<8x32xf32>
    %130 = arith.subf %128, %129 : vector<8x32xf32>
    %131 = vector.extract_strided_slice %123 {offsets = [0, 96], sizes = [8, 32], strides = [1, 1]} : vector<8x128xf32> to vector<8x32xf32>
    %132 = arith.mulf %125, %107 : vector<8x32xf32>
    %133 = arith.mulf %124, %130 : vector<8x32xf32>
    %134 = arith.addf %132, %133 : vector<8x32xf32>
    %135 = math.tanh %134 : vector<8x32xf32>
    %136 = arith.mulf %131, %135 : vector<8x32xf32>
    %137 = arith.index_cast %c4_i32 : i32 to index
    %c0_44 = arith.constant 0 : index
    %c0_45 = arith.constant 0 : index
    %138 = vector.load %arg3[%137, %c0_44, %c0_45] : memref<8x8x32xf32, #tpu.memory_space<vmem>>, vector<1x8x32xf32>
    %139 = vector.shape_cast %138 : vector<1x8x32xf32> to vector<8x32xf32>
    %140 = vector.shape_cast %136 : vector<8x32xf32> to vector<1x8x32xf32>
    tpu.vector_store %arg3[%137, %c0_44, %c0_45], %140 {strides = array<i32>} : memref<8x8x32xf32, #tpu.memory_space<vmem>>, vector<1x8x32xf32>,
    %c5_i32 = arith.constant 5 : i32
    %141 = arith.index_cast %c5_i32 : i32 to index
    %c0_46 = arith.constant 0 : index
    %c0_47 = arith.constant 0 : index
    %142 = vector.load %arg1[%141, %c0_46, %c0_47] : memref<8x8x128xf32, #tpu.memory_space<vmem>>, vector<1x8x128xf32>
    %143 = vector.shape_cast %142 : vector<1x8x128xf32> to vector<8x128xf32>
    %cst_48 = arith.constant dense<0.000000e+00> : vector<8x128xf32>
    %144 = tpu.matmul %136, %3, %cst_48 {dimension_numbers = #tpu.dot_dimension_numbers<[1], [0], [0], [1], [0, 0, 1, 1], [], []>} : vector<8x32xf32>, vector<32x128xf32>, vector<8x128xf32> -> vector<8x128xf32>
    %145 = arith.addf %143, %144 : vector<8x128xf32>
    %146 = arith.negf %145 : vector<8x128xf32>
    %147 = math.exp %146 : vector<8x128xf32>
    %cst_49 = arith.constant 1.000000e+00 : f32
    %148 = vector.broadcast %cst_49 : f32 to vector<8x128xf32>
    %149 = arith.addf %148, %147 : vector<8x128xf32>
    %150 = arith.divf %148, %149 : vector<8x128xf32>
    %151 = vector.extract_strided_slice %150 {offsets = [0, 0], sizes = [8, 32], strides = [1, 1]} : vector<8x128xf32> to vector<8x32xf32>
    %152 = vector.extract_strided_slice %150 {offsets = [0, 32], sizes = [8, 32], strides = [1, 1]} : vector<8x128xf32> to vector<8x32xf32>
    %153 = vector.extract_strided_slice %150 {offsets = [0, 64], sizes = [8, 32], strides = [1, 1]} : vector<8x128xf32> to vector<8x32xf32>
    %cst_50 = arith.constant 2.000000e+00 : f32
    %154 = vector.broadcast %cst_50 : f32 to vector<8x32xf32>
    %155 = arith.mulf %154, %153 : vector<8x32xf32>
    %cst_51 = arith.constant 1.000000e+00 : f32
    %156 = vector.broadcast %cst_51 : f32 to vector<8x32xf32>
    %157 = arith.subf %155, %156 : vector<8x32xf32>
    %158 = vector.extract_strided_slice %150 {offsets = [0, 96], sizes = [8, 32], strides = [1, 1]} : vector<8x128xf32> to vector<8x32xf32>
    %159 = arith.mulf %152, %134 : vector<8x32xf32>
    %160 = arith.mulf %151, %157 : vector<8x32xf32>
    %161 = arith.addf %159, %160 : vector<8x32xf32>
    %162 = math.tanh %161 : vector<8x32xf32>
    %163 = arith.mulf %158, %162 : vector<8x32xf32>
    %164 = arith.index_cast %c5_i32 : i32 to index
    %c0_52 = arith.constant 0 : index
    %c0_53 = arith.constant 0 : index
    %165 = vector.load %arg3[%164, %c0_52, %c0_53] : memref<8x8x32xf32, #tpu.memory_space<vmem>>, vector<1x8x32xf32>
    %166 = vector.shape_cast %165 : vector<1x8x32xf32> to vector<8x32xf32>
    %167 = vector.shape_cast %163 : vector<8x32xf32> to vector<1x8x32xf32>
    tpu.vector_store %arg3[%164, %c0_52, %c0_53], %167 {strides = array<i32>} : memref<8x8x32xf32, #tpu.memory_space<vmem>>, vector<1x8x32xf32>,
    %c6_i32 = arith.constant 6 : i32
    %168 = arith.index_cast %c6_i32 : i32 to index
    %c0_54 = arith.constant 0 : index
    %c0_55 = arith.constant 0 : index
    %169 = vector.load %arg1[%168, %c0_54, %c0_55] : memref<8x8x128xf32, #tpu.memory_space<vmem>>, vector<1x8x128xf32>
    %170 = vector.shape_cast %169 : vector<1x8x128xf32> to vector<8x128xf32>
    %cst_56 = arith.constant dense<0.000000e+00> : vector<8x128xf32>
    %171 = tpu.matmul %163, %3, %cst_56 {dimension_numbers = #tpu.dot_dimension_numbers<[1], [0], [0], [1], [0, 0, 1, 1], [], []>} : vector<8x32xf32>, vector<32x128xf32>, vector<8x128xf32> -> vector<8x128xf32>
    %172 = arith.addf %170, %171 : vector<8x128xf32>
    %173 = arith.negf %172 : vector<8x128xf32>
    %174 = math.exp %173 : vector<8x128xf32>
    %cst_57 = arith.constant 1.000000e+00 : f32
    %175 = vector.broadcast %cst_57 : f32 to vector<8x128xf32>
    %176 = arith.addf %175, %174 : vector<8x128xf32>
    %177 = arith.divf %175, %176 : vector<8x128xf32>
    %178 = vector.extract_strided_slice %177 {offsets = [0, 0], sizes = [8, 32], strides = [1, 1]} : vector<8x128xf32> to vector<8x32xf32>
    %179 = vector.extract_strided_slice %177 {offsets = [0, 32], sizes = [8, 32], strides = [1, 1]} : vector<8x128xf32> to vector<8x32xf32>
    %180 = vector.extract_strided_slice %177 {offsets = [0, 64], sizes = [8, 32], strides = [1, 1]} : vector<8x128xf32> to vector<8x32xf32>
    %cst_58 = arith.constant 2.000000e+00 : f32
    %181 = vector.broadcast %cst_58 : f32 to vector<8x32xf32>
    %182 = arith.mulf %181, %180 : vector<8x32xf32>
    %cst_59 = arith.constant 1.000000e+00 : f32
    %183 = vector.broadcast %cst_59 : f32 to vector<8x32xf32>
    %184 = arith.subf %182, %183 : vector<8x32xf32>
    %185 = vector.extract_strided_slice %177 {offsets = [0, 96], sizes = [8, 32], strides = [1, 1]} : vector<8x128xf32> to vector<8x32xf32>
    %186 = arith.mulf %179, %161 : vector<8x32xf32>
    %187 = arith.mulf %178, %184 : vector<8x32xf32>
    %188 = arith.addf %186, %187 : vector<8x32xf32>
    %189 = math.tanh %188 : vector<8x32xf32>
    %190 = arith.mulf %185, %189 : vector<8x32xf32>
    %191 = arith.index_cast %c6_i32 : i32 to index
    %c0_60 = arith.constant 0 : index
    %c0_61 = arith.constant 0 : index
    %192 = vector.load %arg3[%191, %c0_60, %c0_61] : memref<8x8x32xf32, #tpu.memory_space<vmem>>, vector<1x8x32xf32>
    %193 = vector.shape_cast %192 : vector<1x8x32xf32> to vector<8x32xf32>
    %194 = vector.shape_cast %190 : vector<8x32xf32> to vector<1x8x32xf32>
    tpu.vector_store %arg3[%191, %c0_60, %c0_61], %194 {strides = array<i32>} : memref<8x8x32xf32, #tpu.memory_space<vmem>>, vector<1x8x32xf32>,
    %c7_i32 = arith.constant 7 : i32
    %195 = arith.index_cast %c7_i32 : i32 to index
    %c0_62 = arith.constant 0 : index
    %c0_63 = arith.constant 0 : index
    %196 = vector.load %arg1[%195, %c0_62, %c0_63] : memref<8x8x128xf32, #tpu.memory_space<vmem>>, vector<1x8x128xf32>
    %197 = vector.shape_cast %196 : vector<1x8x128xf32> to vector<8x128xf32>
    %cst_64 = arith.constant dense<0.000000e+00> : vector<8x128xf32>
    %198 = tpu.matmul %190, %3, %cst_64 {dimension_numbers = #tpu.dot_dimension_numbers<[1], [0], [0], [1], [0, 0, 1, 1], [], []>} : vector<8x32xf32>, vector<32x128xf32>, vector<8x128xf32> -> vector<8x128xf32>
    %199 = arith.addf %197, %198 : vector<8x128xf32>
    %200 = arith.negf %199 : vector<8x128xf32>
    %201 = math.exp %200 : vector<8x128xf32>
    %cst_65 = arith.constant 1.000000e+00 : f32
    %202 = vector.broadcast %cst_65 : f32 to vector<8x128xf32>
    %203 = arith.addf %202, %201 : vector<8x128xf32>
    %204 = arith.divf %202, %203 : vector<8x128xf32>
    %205 = vector.extract_strided_slice %204 {offsets = [0, 0], sizes = [8, 32], strides = [1, 1]} : vector<8x128xf32> to vector<8x32xf32>
    %206 = vector.extract_strided_slice %204 {offsets = [0, 32], sizes = [8, 32], strides = [1, 1]} : vector<8x128xf32> to vector<8x32xf32>
    %207 = vector.extract_strided_slice %204 {offsets = [0, 64], sizes = [8, 32], strides = [1, 1]} : vector<8x128xf32> to vector<8x32xf32>
    %cst_66 = arith.constant 2.000000e+00 : f32
    %208 = vector.broadcast %cst_66 : f32 to vector<8x32xf32>
    %209 = arith.mulf %208, %207 : vector<8x32xf32>
    %cst_67 = arith.constant 1.000000e+00 : f32
    %210 = vector.broadcast %cst_67 : f32 to vector<8x32xf32>
    %211 = arith.subf %209, %210 : vector<8x32xf32>
    %212 = vector.extract_strided_slice %204 {offsets = [0, 96], sizes = [8, 32], strides = [1, 1]} : vector<8x128xf32> to vector<8x32xf32>
    %213 = arith.mulf %206, %188 : vector<8x32xf32>
    %214 = arith.mulf %205, %211 : vector<8x32xf32>
    %215 = arith.addf %213, %214 : vector<8x32xf32>
    %216 = math.tanh %215 : vector<8x32xf32>
    %217 = arith.mulf %212, %216 : vector<8x32xf32>
    %218 = arith.index_cast %c7_i32 : i32 to index
    %c0_68 = arith.constant 0 : index
    %c0_69 = arith.constant 0 : index
    %219 = vector.load %arg3[%218, %c0_68, %c0_69] : memref<8x8x32xf32, #tpu.memory_space<vmem>>, vector<1x8x32xf32>
    %220 = vector.shape_cast %219 : vector<1x8x32xf32> to vector<8x32xf32>
    %221 = vector.shape_cast %217 : vector<8x32xf32> to vector<1x8x32xf32>
    tpu.vector_store %arg3[%218, %c0_68, %c0_69], %221 {strides = array<i32>} : memref<8x8x32xf32, #tpu.memory_space<vmem>>, vector<1x8x32xf32>,
    %c8_i32 = arith.constant 8 : i32
    %c0_70 = arith.constant 0 : index
    %c0_71 = arith.constant 0 : index
    %222 = vector.load %arg4[%c0_70, %c0_71] : memref<8x32xf32, #tpu.memory_space<vmem>>, vector<8x32xf32>
    tpu.vector_store %arg4[%c0_70, %c0_71], %217 {strides = array<i32>} : memref<8x32xf32, #tpu.memory_space<vmem>>, vector<8x32xf32>,
    %c0_72 = arith.constant 0 : index
    %c0_73 = arith.constant 0 : index
    %223 = vector.load %arg5[%c0_72, %c0_73] : memref<8x32xf32, #tpu.memory_space<vmem>>, vector<8x32xf32>
    tpu.vector_store %arg5[%c0_72, %c0_73], %215 {strides = array<i32>} : memref<8x32xf32, #tpu.memory_space<vmem>>, vector<8x32xf32>,
    return
  }
  func.func @transform_0(%arg0: i32) -> (i32, i32, i32) {
    %c0_i32 = arith.constant 0 : i32
    %c0_i32_0 = arith.constant 0 : i32
    %c0_i32_1 = arith.constant 0 : i32
    return %arg0, %c0_i32, %c0_i32_0 : i32, i32, i32
  }
  func.func @transform_1(%arg0: i32) -> (i32, i32) {
    %c0_i32 = arith.constant 0 : i32
    %c0_i32_0 = arith.constant 0 : i32
    %c0_i32_1 = arith.constant 0 : i32
    return %c0_i32, %c0_i32_0 : i32, i32
  }
  func.func @transform_2(%arg0: i32) -> (i32, i32, i32) {
    %c0_i32 = arith.constant 0 : i32
    %c0_i32_0 = arith.constant 0 : i32
    %c0_i32_1 = arith.constant 0 : i32
    return %arg0, %c0_i32, %c0_i32_0 : i32, i32, i32
  }
}

</mosaic_0001>

<bundles_post_ra>
// kernel: tpu_custom_call.1
= control target key start
LH: loop header
LB: loop body
LE: loop exit
PB: predicated region body
PF: predicated region fallthrough
CT: control target
= control target key end

     0   :  { %7 = vsyncpa [#allocation5], 0  ;;  %s1391_s0 = inlined_call_operand.hbm [shape: f32[8,8,128], index: 0, kind: input, shape index: {}]   ;;  %s1392_s1 = inlined_call_operand.hbm [shape: f32[32,128], index: 1, kind: input, shape index: {}]   ;;  %s1393_s2 = inlined_call_operand.hbm [shape: f32[8,8,32], index: 2, kind: output, shape index: {}]  }
   0x1   :  { %8 = vsyncpa [#allocation8], 0 }
   0x2   :  { %9 = vsyncpa [#allocation6], 0  ;;  %s1205_s9 = smov [#allocation4]  }
   0x3   :  { %s15_s10 = sshll.u32 %s1205_s9, 4  ;;  %s16_s10 = int_to_ptr.vmem [resolvable:$true] %s15_s10 }
   0x4   :  { %s1147_s11 = scalar_lea.vmem %s16_s10, 1024  ;;  %p1152_p1 = scmp.lt.s32.totalorder %s16_s10, %s16_s10 }
   0x5   :  { %p1148_p0 = scmp.ne.s32.totalorder %s16_s10, %s1147_s11  ;;  %p1153_p2 = scmp.lt.s32.totalorder %s1147_s11, %s1147_s11 }
   0x7   :  { %p1154_p3 = por %p1153_p2, %p1152_p1 }
   0x9   :  { %p1155_p4 = pnand %p1154_p3, %p1148_p0 }
   0xb   :  { %1158 = shalt.err (!%p1155_p4)
}
   0xc   :  { %s1206_s12 = smov 128   ;;  %s1207_s13 = smov 8  }
   0xd   :  { %21 = dma.hbm_to_vmem [thread:$0]  %s1391_s0, 1024, %s16_s10, [#allocation5], %s1206_s12, %s1206_s12, %s1207_s13  }
   0xe   :  { %s1208_s16 = smov [#allocation7]  }
   0xf   :  { %s27_s17 = sshll.u32 %s1208_s16, 4  ;;  %s28_s17 = int_to_ptr.vmem [resolvable:$true] %s27_s17 }
  0x10   :  { %s1167_s18 = scalar_lea.vmem %s28_s17, 512  ;;  %p1172_p6 = scmp.lt.s32.totalorder %s28_s17, %s28_s17 }
  0x11   :  { %p1168_p5 = scmp.ne.s32.totalorder %s28_s17, %s1167_s18  ;;  %p1173_p7 = scmp.lt.s32.totalorder %s1167_s18, %s1167_s18 }
  0x13   :  { %p1174_p8 = por %p1173_p7, %p1172_p6 }
  0x15   :  { %p1175_p9 = pnand %p1174_p8, %p1168_p5 }
  0x17   :  { %1178 = shalt.err (!%p1175_p9)
}
  0x18   :  { %33 = dma.hbm_to_vmem [thread:$0]  %s1392_s1, 512, %s28_s17, [#allocation8], %s1206_s12, %s1206_s12, %s1207_s13  }
  0x19   :  { %1199 = dma.done.wait [#allocation5], 1024  }
  0x1a   :  { %1200 = vsyncadd [#allocation5], 4294966272 }
  0x1b   :  { %1201 = dma.done.wait [#allocation8], 512  }
  0x1c   :  { %1202 = vsyncadd [#allocation8], 4294966784  ;;  %vm44_vm0 = vcmask 261120   ;;  %v1209_v0 = vmov 0.0   ;;  %vm1210_vm1 = vmmov 0   ;;  %v1252_v1 = vld [vmem:[#allocation7 + $0x18] sm:$0xff] }
  0x1d   :  { %993 = vmatprep.subr.mxu0 %v1209_v0  ;;  %1001 = vmatprep.mubr.msk.f32.mxu0 %vm1210_vm1, %v1209_v0  ;;  %45 = vst.msk [vmem:[#allocation2] sm:$0xff] %vm44_vm0, %v1209_v0  ;;  %46 = vst.msk [vmem:[#allocation3] sm:$0xff] %vm44_vm0, %v1209_v0  ;;  %v1254_v2 = vld [vmem:[#allocation7 + $0x10] sm:$0xff]  ;;  %v1259_v3 = vld [vmem:[#allocation7 + $0x8] sm:$0xff]  ;;  %s1211_s0 = smov 64   ;;  %s1212_s1 = smov 32  }
  0x1e   :  { %1004 = vmatprep.subr.mxu1 %v1209_v0  ;;  %1012 = vmatprep.mubr.msk.f32.mxu1 %vm1210_vm1, %v1209_v0  ;;  %v1265_v4 = vld [vmem:[#allocation7] sm:$0xff]  ;;  %v164_v27 = vld [vmem:[#allocation4 + $0x8] sm:$0xff]  ;;  %v270_v46 = vld [vmem:[#allocation4 + $0x10] sm:$0xff]  ;;  %s1213_s21 = smov 96   ;;  %s1214_s22 = smov [#allocation9]  }
  0x1f   :  { %994 = vmatpush3.msra.mxu0 %v1252_v1  ;;  %1005 = vmatpush3.msra.mxu1 %v1252_v1  ;;  %v53_v6 = vld [vmem:[#allocation4] sm:$0xff]  ;;  %s916_s23 = sshll.u32 %s1214_s22, 4  ;;  %s917_s23 = int_to_ptr.vmem [resolvable:$true] %s916_s23 }
  0x20   :  { %995 = vmatprep.subr.mxu0 %v1209_v0  ;;  %1006 = vmatprep.subr.mxu1 %v1209_v0  ;;  %s1179_s24 = scalar_lea.vmem %s917_s23, 1024  ;;  %p1184_p11 = scmp.lt.s32.totalorder %s917_s23, %s917_s23 }
  0x21   :  { %996 = vmatpush3.msra.mxu0 %v1254_v2  ;;  %1007 = vmatpush3.msra.mxu1 %v1254_v2  ;;  %p1180_p10 = scmp.ne.s32.totalorder %s917_s23, %s1179_s24  ;;  %p1185_p12 = scmp.lt.s32.totalorder %s1179_s24, %s1179_s24 }
  0x22   :  { %997 = vmatprep.subr.mxu0 %v1209_v0  ;;  %1008 = vmatprep.subr.mxu1 %v1209_v0 }
  0x23   :  { %998 = vmatpush3.msra.mxu0 %v1259_v3  ;;  %1009 = vmatpush3.msra.mxu1 %v1259_v3  ;;  %p1186_p13 = por %p1185_p12, %p1184_p11 }
  0x24   :  { %v51_v5 = vld [vmem:[#allocation2] sm:$0xff]  ;;  %999 = vmatprep.subr.mxu0 %v1209_v0  ;;  %1010 = vmatprep.subr.mxu1 %v1209_v0  ;;  %v52_v16 = vld [vmem:[#allocation3] sm:$0xff] }
  0x25   :  { %1000 = vmatpush3.msra.mxu0 %v1265_v4  ;;  %1011 = vmatpush3.msra.mxu1 %v1265_v4  ;;  %p1187_p0 = pnand %p1186_p13, %p1180_p10 }
  0x26   :  { %1002 = vmatmul.mubr.msk.f32.vlgmr.msra.gmra.mxu0 %vm44_vm0, %v51_v5  ;;  %1015 = vmatprep.subr.mxu0 %v1209_v0 }
  0x27   :  { %1016 = vmatpush3.msra.mxu0 %v1252_v1  ;;  %1023 = vmatprep.mubr.msk.f32.mxu0 %vm1210_vm1, %v1209_v0 }
  0x28   :  { %1017 = vmatprep.subr.mxu0 %v1209_v0  ;;  %1026 = vmatprep.subr.mxu1 %v1209_v0 }
  0x29   :  { %1018 = vmatpush3.msra.mxu0 %v1254_v2 }
  0x2a   :  { %1019 = vmatprep.subr.mxu0 %v1209_v0 }
  0x2b   :  { %1020 = vmatpush3.msra.mxu0 %v1259_v3 }
  0x2c   :  { %1021 = vmatprep.subr.mxu0 %v1209_v0 }
  0x2d   :  { %1022 = vmatpush3.msra.mxu0 %v1265_v4 }
  0x2e   :  { %1037 = vmatprep.subr.mxu0 %v1209_v0 }
  0xe6   :  { %v124_v7 = vpop.f32.mrf.mxu0 }
  0xe7   :  { %v128_v8 = vadd.f32 %v124_v7, %v53_v6  ;;  %v376_v6 = vld [vmem:[#allocation4 + $0x18] sm:$0xff] }
  0xe8   :  { %v1003_v9 = vpop.f32.mrf.mxu0 }
  0xe9   :  { %v930_v10 = vmul.f32 -1.442695, %v128_v8 }
  0xeb   :  { %1091 = vpow2.f32 %v930_v10 }
  0xf8   :  { %v1092_v11 = vpop.eup %1091 }
  0xf9   :  { %v132_v12 = vadd.f32 1.0, %v1092_v11 }
  0xfb   :  { %1093 = vrcp.f32 %v132_v12 }
 0x108   :  { %v1094_v13 = vpop.eup %1093 }
 0x109   :  { %v135_v14 = vmul.f32 2.0, %v1094_v13 }
 0x10b   :  { %v931_v15 = vadd.f32 -1.0, %v135_v14 }
 0x10d   :  { %143 = vrot.lane.b32.xlu0 %v931_v15, %s1211_s0 }
 0x111   :  { %138 = vrot.lane.b32.xlu0 %v52_v16, %s1212_s1 }
 0x17f   :  { %v144_v17 = vpop.permute.xlu0 %143 }
 0x180   :  { %v146_v18 = vmul.f32 %v1094_v13, %v144_v17 }
 0x182   :  { %148 = vrot.lane.b32.xlu1 %v146_v18, %s1212_s1 }
 0x183   :  { %v139_v19 = vpop.permute.xlu0 %138 }
 0x184   :  { %v141_v20 = vmul.f32 %v1094_v13, %v139_v19 }
 0x1f4   :  { %v149_v21 = vpop.permute.xlu1 %148 }
 0x1f5   :  { %v151_v22 = vadd.f32 %v149_v21, %v141_v20 }
 0x1f7   :  { %1095 = vtanh.f32 %v151_v22 }
 0x204   :  { %v1096_v23 = vpop.eup %1095 }
 0x205   :  { %154 = vrot.lane.b32.xlu1 %v1096_v23, %s1211_s0 }
 0x277   :  { %v155_v24 = vpop.permute.xlu1 %154 }
 0x278   :  { %v157_v25 = vmul.f32 %v1094_v13, %v155_v24 }
 0x27a   :  { %159 = vrot.lane.b32.xlu0 %v157_v25, %s1212_s1  ;;  %v482_v25 = vld [vmem:[#allocation4 + $0x20] sm:$0xff] }
 0x2ec   :  { %v160_v26 = vpop.permute.xlu0 %159 }
 0x2ed   :  { %162 = vst.msk [vmem:[#allocation9] sm:$0xff] %vm44_vm0, %v160_v26  ;;  %1013 = vmatmul.mubr.msk.f32.vlgmr.msra.gmra.mxu1 %vm44_vm0, %v160_v26 }
 0x2ee   :  { %1027 = vmatpush3.msra.mxu1 %v1252_v1  ;;  %1034 = vmatprep.mubr.msk.f32.mxu1 %vm1210_vm1, %v1209_v0 }
 0x2ef   :  { %1028 = vmatprep.subr.mxu1 %v1209_v0 }
 0x2f0   :  { %1029 = vmatpush3.msra.mxu1 %v1254_v2 }
 0x2f1   :  { %1030 = vmatprep.subr.mxu1 %v1209_v0 }
 0x2f2   :  { %1031 = vmatpush3.msra.mxu1 %v1259_v3 }
 0x2f3   :  { %1032 = vmatprep.subr.mxu1 %v1209_v0 }
 0x2f4   :  { %1033 = vmatpush3.msra.mxu1 %v1265_v4 }
 0x2f5   :  { %1048 = vmatprep.subr.mxu1 %v1209_v0 }
 0x3ad   :  { %v233_v28 = vpop.f32.mrf.mxu1 }
 0x3ae   :  { %v237_v29 = vadd.f32 %v233_v28, %v164_v27 }
 0x3af   :  { %v1014_v30 = vpop.f32.mrf.mxu1 }
 0x3b0   :  { %v933_v31 = vmul.f32 -1.442695, %v237_v29 }
 0x3b2   :  { %1097 = vpow2.f32 %v933_v31 }
 0x3bf   :  { %v1098_v32 = vpop.eup %1097 }
 0x3c0   :  { %v241_v33 = vadd.f32 1.0, %v1098_v32 }
 0x3c2   :  { %1099 = vrcp.f32 %v241_v33 }
 0x3cf   :  { %v1100_v34 = vpop.eup %1099 }
 0x3d0   :  { %v244_v35 = vmul.f32 2.0, %v1100_v34  ;;  %v246_v39 = vmul.f32 %v1100_v34, %v151_v22 }
 0x3d2   :  { %v934_v36 = vadd.f32 -1.0, %v244_v35 }
 0x3d4   :  { %248 = vrot.lane.b32.xlu1 %v934_v36, %s1211_s0 }
 0x446   :  { %v249_v37 = vpop.permute.xlu1 %248 }
 0x447   :  { %v251_v38 = vmul.f32 %v1100_v34, %v249_v37 }
 0x449   :  { %253 = vrot.lane.b32.xlu0 %v251_v38, %s1212_s1 }
 0x4bb   :  { %v254_v40 = vpop.permute.xlu0 %253 }
 0x4bc   :  { %v256_v41 = vadd.f32 %v254_v40, %v246_v39 }
 0x4be   :  { %1101 = vtanh.f32 %v256_v41 }
 0x4cb   :  { %v1102_v42 = vpop.eup %1101 }
 0x4cc   :  { %259 = vrot.lane.b32.xlu1 %v1102_v42, %s1211_s0 }
 0x53e   :  { %v260_v43 = vpop.permute.xlu1 %259 }
 0x53f   :  { %v262_v44 = vmul.f32 %v1100_v34, %v260_v43 }
 0x541   :  { %264 = vrot.lane.b32.xlu0 %v262_v44, %s1212_s1  ;;  %v588_v44 = vld [vmem:[#allocation4 + $0x28] sm:$0xff] }
 0x5b3   :  { %v265_v45 = vpop.permute.xlu0 %264 }
 0x5b4   :  { %268 = vst.msk [vmem:[#allocation9 + $0x8] sm:$0xff] %vm44_vm0, %v265_v45  ;;  %1024 = vmatmul.mubr.msk.f32.vlgmr.msra.gmra.mxu0 %vm44_vm0, %v265_v45 }
 0x5b5   :  { %1038 = vmatpush3.msra.mxu0 %v1252_v1  ;;  %1045 = vmatprep.mubr.msk.f32.mxu0 %vm1210_vm1, %v1209_v0 }
 0x5b6   :  { %1039 = vmatprep.subr.mxu0 %v1209_v0 }
 0x5b7   :  { %1040 = vmatpush3.msra.mxu0 %v1254_v2 }
 0x5b8   :  { %1041 = vmatprep.subr.mxu0 %v1209_v0 }
 0x5b9   :  { %1042 = vmatpush3.msra.mxu0 %v1259_v3 }
 0x5ba   :  { %1043 = vmatprep.subr.mxu0 %v1209_v0 }
 0x5bb   :  { %1044 = vmatpush3.msra.mxu0 %v1265_v4 }
 0x5bc   :  { %1059 = vmatprep.subr.mxu0 %v1209_v0 }
 0x674   :  { %v339_v47 = vpop.f32.mrf.mxu0 }
 0x675   :  { %v343_v48 = vadd.f32 %v339_v47, %v270_v46 }
 0x676   :  { %v1025_v49 = vpop.f32.mrf.mxu0 }
 0x677   :  { %v936_v50 = vmul.f32 -1.442695, %v343_v48 }
 0x679   :  { %1103 = vpow2.f32 %v936_v50 }
 0x686   :  { %v1104_v51 = vpop.eup %1103 }
 0x687   :  { %v347_v52 = vadd.f32 1.0, %v1104_v51 }
 0x689   :  { %1105 = vrcp.f32 %v347_v52 }
 0x696   :  { %v1106_v53 = vpop.eup %1105 }
 0x697   :  { %v350_v54 = vmul.f32 2.0, %v1106_v53  ;;  %v352_v58 = vmul.f32 %v1106_v53, %v256_v41 }
 0x699   :  { %v937_v55 = vadd.f32 -1.0, %v350_v54 }
 0x69b   :  { %354 = vrot.lane.b32.xlu1 %v937_v55, %s1211_s0 }
 0x70d   :  { %v355_v56 = vpop.permute.xlu1 %354 }
 0x70e   :  { %v357_v57 = vmul.f32 %v1106_v53, %v355_v56 }
 0x710   :  { %359 = vrot.lane.b32.xlu0 %v357_v57, %s1212_s1 }
 0x782   :  { %v360_v59 = vpop.permute.xlu0 %359 }
 0x783   :  { %v362_v60 = vadd.f32 %v360_v59, %v352_v58  ;;  %v694_v58 = vld [vmem:[#allocation4 + $0x30] sm:$0xff] }
 0x785   :  { %1107 = vtanh.f32 %v362_v60 }
 0x792   :  { %v1108_v61 = vpop.eup %1107 }
 0x793   :  { %365 = vrot.lane.b32.xlu1 %v1108_v61, %s1211_s0 }
 0x805   :  { %v366_v62 = vpop.permute.xlu1 %365 }
 0x806   :  { %v368_v63 = vmul.f32 %v1106_v53, %v366_v62 }
 0x808   :  { %370 = vrot.lane.b32.xlu0 %v368_v63, %s1212_s1 }
 0x87a   :  { %v371_v5 = vpop.permute.xlu0 %370 }
 0x87b   :  { %374 = vst.msk [vmem:[#allocation9 + $0x10] sm:$0xff] %vm44_vm0, %v371_v5  ;;  %1035 = vmatmul.mubr.msk.f32.vlgmr.msra.gmra.mxu1 %vm44_vm0, %v371_v5 }
 0x87c   :  { %1049 = vmatpush3.msra.mxu1 %v1252_v1  ;;  %1056 = vmatprep.mubr.msk.f32.mxu1 %vm1210_vm1, %v1209_v0 }
 0x87d   :  { %1050 = vmatprep.subr.mxu1 %v1209_v0 }
 0x87e   :  { %1051 = vmatpush3.msra.mxu1 %v1254_v2 }
 0x87f   :  { %1052 = vmatprep.subr.mxu1 %v1209_v0 }
 0x880   :  { %1053 = vmatpush3.msra.mxu1 %v1259_v3 }
 0x881   :  { %1054 = vmatprep.subr.mxu1 %v1209_v0 }
 0x882   :  { %1055 = vmatpush3.msra.mxu1 %v1265_v4 }
 0x883   :  { %1070 = vmatprep.subr.mxu1 %v1209_v0 }
 0x93b   :  { %v445_v7 = vpop.f32.mrf.mxu1 }
 0x93c   :  { %v449_v8 = vadd.f32 %v445_v7, %v376_v6 }
 0x93d   :  { %v1036_v9 = vpop.f32.mrf.mxu1 }
 0x93e   :  { %v939_v10 = vmul.f32 -1.442695, %v449_v8 }
 0x940   :  { %1109 = vpow2.f32 %v939_v10 }
 0x94d   :  { %v1110_v11 = vpop.eup %1109 }
 0x94e   :  { %v453_v12 = vadd.f32 1.0, %v1110_v11 }
 0x950   :  { %1111 = vrcp.f32 %v453_v12 }
 0x95d   :  { %v1112_v13 = vpop.eup %1111 }
 0x95e   :  { %v456_v14 = vmul.f32 2.0, %v1112_v13  ;;  %v458_v18 = vmul.f32 %v1112_v13, %v362_v60 }
 0x960   :  { %v940_v15 = vadd.f32 -1.0, %v456_v14 }
 0x962   :  { %460 = vrot.lane.b32.xlu1 %v940_v15, %s1211_s0 }
 0x9d4   :  { %v461_v16 = vpop.permute.xlu1 %460 }
 0x9d5   :  { %v463_v17 = vmul.f32 %v1112_v13, %v461_v16 }
 0x9d7   :  { %465 = vrot.lane.b32.xlu0 %v463_v17, %s1212_s1 }
 0xa49   :  { %v466_v19 = vpop.permute.xlu0 %465 }
 0xa4a   :  { %v468_v20 = vadd.f32 %v466_v19, %v458_v18  ;;  %v800_v18 = vld [vmem:[#allocation4 + $0x38] sm:$0xff] }
 0xa4c   :  { %1113 = vtanh.f32 %v468_v20 }
 0xa59   :  { %v1114_v21 = vpop.eup %1113 }
 0xa5a   :  { %471 = vrot.lane.b32.xlu1 %v1114_v21, %s1211_s0 }
 0xacc   :  { %v472_v22 = vpop.permute.xlu1 %471 }
 0xacd   :  { %v474_v23 = vmul.f32 %v1112_v13, %v472_v22 }
 0xacf   :  { %476 = vrot.lane.b32.xlu0 %v474_v23, %s1212_s1 }
 0xb41   :  { %v477_v24 = vpop.permute.xlu0 %476 }
 0xb42   :  { %480 = vst.msk [vmem:[#allocation9 + $0x18] sm:$0xff] %vm44_vm0, %v477_v24  ;;  %1046 = vmatmul.mubr.msk.f32.vlgmr.msra.gmra.mxu0 %vm44_vm0, %v477_v24 }
 0xb43   :  { %1060 = vmatpush3.msra.mxu0 %v1252_v1  ;;  %1067 = vmatprep.mubr.msk.f32.mxu0 %vm1210_vm1, %v1209_v0 }
 0xb44   :  { %1061 = vmatprep.subr.mxu0 %v1209_v0 }
 0xb45   :  { %1062 = vmatpush3.msra.mxu0 %v1254_v2 }
 0xb46   :  { %1063 = vmatprep.subr.mxu0 %v1209_v0 }
 0xb47   :  { %1064 = vmatpush3.msra.mxu0 %v1259_v3 }
 0xb48   :  { %1065 = vmatprep.subr.mxu0 %v1209_v0 }
 0xb49   :  { %1066 = vmatpush3.msra.mxu0 %v1265_v4 }
 0xc02   :  { %v551_v26 = vpop.f32.mrf.mxu0 }
 0xc03   :  { %v555_v27 = vadd.f32 %v551_v26, %v482_v25 }
 0xc04   :  { %v1047_v28 = vpop.f32.mrf.mxu0 }
 0xc05   :  { %v942_v29 = vmul.f32 -1.442695, %v555_v27 }
 0xc07   :  { %1115 = vpow2.f32 %v942_v29 }
 0xc14   :  { %v1116_v30 = vpop.eup %1115 }
 0xc15   :  { %v559_v31 = vadd.f32 1.0, %v1116_v30 }
 0xc17   :  { %1117 = vrcp.f32 %v559_v31 }
 0xc24   :  { %v1118_v32 = vpop.eup %1117 }
 0xc25   :  { %v562_v33 = vmul.f32 2.0, %v1118_v32  ;;  %v564_v37 = vmul.f32 %v1118_v32, %v468_v20 }
 0xc27   :  { %v943_v34 = vadd.f32 -1.0, %v562_v33 }
 0xc29   :  { %566 = vrot.lane.b32.xlu1 %v943_v34, %s1211_s0 }
 0xc9b   :  { %v567_v35 = vpop.permute.xlu1 %566 }
 0xc9c   :  { %v569_v36 = vmul.f32 %v1118_v32, %v567_v35 }
 0xc9e   :  { %571 = vrot.lane.b32.xlu0 %v569_v36, %s1212_s1 }
 0xd10   :  { %v572_v38 = vpop.permute.xlu0 %571 }
 0xd11   :  { %v574_v39 = vadd.f32 %v572_v38, %v564_v37 }
 0xd13   :  { %1119 = vtanh.f32 %v574_v39 }
 0xd20   :  { %v1120_v40 = vpop.eup %1119 }
 0xd21   :  { %577 = vrot.lane.b32.xlu1 %v1120_v40, %s1211_s0 }
 0xd93   :  { %v578_v41 = vpop.permute.xlu1 %577 }
 0xd94   :  { %v580_v42 = vmul.f32 %v1118_v32, %v578_v41 }
 0xd96   :  { %582 = vrot.lane.b32.xlu0 %v580_v42, %s1212_s1 }
 0xe08   :  { %v583_v43 = vpop.permute.xlu0 %582 }
 0xe09   :  { %586 = vst.msk [vmem:[#allocation9 + $0x20] sm:$0xff] %vm44_vm0, %v583_v43  ;;  %1057 = vmatmul.mubr.msk.f32.vlgmr.msra.gmra.mxu1 %vm44_vm0, %v583_v43 }
 0xe0a   :  { %1071 = vmatpush3.msra.mxu1 %v1252_v1  ;;  %1078 = vmatprep.mubr.msk.f32.mxu1 %vm1210_vm1, %v1209_v0 }
 0xe0b   :  { %1072 = vmatprep.subr.mxu1 %v1209_v0 }
 0xe0c   :  { %1073 = vmatpush3.msra.mxu1 %v1254_v2 }
 0xe0d   :  { %1074 = vmatprep.subr.mxu1 %v1209_v0 }
 0xe0e   :  { %1075 = vmatpush3.msra.mxu1 %v1259_v3 }
 0xe0f   :  { %1076 = vmatprep.subr.mxu1 %v1209_v0 }
 0xe10   :  { %1077 = vmatpush3.msra.mxu1 %v1265_v4 }
 0xec9   :  { %v657_v45 = vpop.f32.mrf.mxu1 }
 0xeca   :  { %v661_v46 = vadd.f32 %v657_v45, %v588_v44 }
 0xecb   :  { %v1058_v47 = vpop.f32.mrf.mxu1 }
 0xecc   :  { %v945_v1 = vmul.f32 -1.442695, %v661_v46 }
 0xece   :  { %1121 = vpow2.f32 %v945_v1 }
 0xedb   :  { %v1122_v48 = vpop.eup %1121 }
 0xedc   :  { %v665_v49 = vadd.f32 1.0, %v1122_v48 }
 0xede   :  { %1123 = vrcp.f32 %v665_v49 }
 0xeeb   :  { %v1124_v50 = vpop.eup %1123 }
 0xeec   :  { %v668_v51 = vmul.f32 2.0, %v1124_v50  ;;  %v670_v0 = vmul.f32 %v1124_v50, %v574_v39 }
 0xeee   :  { %v946_v2 = vadd.f32 -1.0, %v668_v51 }
 0xef0   :  { %672 = vrot.lane.b32.xlu1 %v946_v2, %s1211_s0 }
 0xf62   :  { %v673_v52 = vpop.permute.xlu1 %672 }
 0xf63   :  { %v675_v3 = vmul.f32 %v1124_v50, %v673_v52 }
 0xf65   :  { %677 = vrot.lane.b32.xlu0 %v675_v3, %s1212_s1 }
 0xfd7   :  { %v678_v4 = vpop.permute.xlu0 %677 }
 0xfd8   :  { %v680_v53 = vadd.f32 %v678_v4, %v670_v0 }
 0xfda   :  { %1125 = vtanh.f32 %v680_v53 }
 0xfe7   :  { %v1126_v54 = vpop.eup %1125 }
 0xfe8   :  { %683 = vrot.lane.b32.xlu1 %v1126_v54, %s1211_s0 }
0x105a   :  { %v684_v55 = vpop.permute.xlu1 %683 }
0x105b   :  { %v686_v56 = vmul.f32 %v1124_v50, %v684_v55 }
0x105d   :  { %688 = vrot.lane.b32.xlu0 %v686_v56, %s1212_s1 }
0x10cf   :  { %v689_v57 = vpop.permute.xlu0 %688 }
0x10d0   :  { %692 = vst.msk [vmem:[#allocation9 + $0x28] sm:$0xff] %vm44_vm0, %v689_v57  ;;  %1068 = vmatmul.mubr.msk.f32.vlgmr.msra.gmra.mxu0 %vm44_vm0, %v689_v57 }
0x1190   :  { %v763_v59 = vpop.f32.mrf.mxu0 }
0x1191   :  { %v767_v60 = vadd.f32 %v763_v59, %v694_v58 }
0x1192   :  { %v1069_v61 = vpop.f32.mrf.mxu0 }
0x1193   :  { %v948_v62 = vmul.f32 -1.442695, %v767_v60 }
0x1195   :  { %1127 = vpow2.f32 %v948_v62 }
0x11a2   :  { %v1128_v63 = vpop.eup %1127 }
0x11a3   :  { %v771_v5 = vadd.f32 1.0, %v1128_v63 }
0x11a5   :  { %1129 = vrcp.f32 %v771_v5 }
0x11b2   :  { %v1130_v6 = vpop.eup %1129 }
0x11b3   :  { %v774_v7 = vmul.f32 2.0, %v1130_v6  ;;  %v776_v11 = vmul.f32 %v1130_v6, %v680_v53 }
0x11b5   :  { %v949_v8 = vadd.f32 -1.0, %v774_v7 }
0x11b7   :  { %778 = vrot.lane.b32.xlu1 %v949_v8, %s1211_s0 }
0x1229   :  { %v779_v9 = vpop.permute.xlu1 %778 }
0x122a   :  { %v781_v10 = vmul.f32 %v1130_v6, %v779_v9 }
0x122c   :  { %783 = vrot.lane.b32.xlu0 %v781_v10, %s1212_s1 }
0x129e   :  { %v784_v12 = vpop.permute.xlu0 %783 }
0x129f   :  { %v786_v13 = vadd.f32 %v784_v12, %v776_v11 }
0x12a1   :  { %1131 = vtanh.f32 %v786_v13 }
0x12ae   :  { %v1132_v14 = vpop.eup %1131 }
0x12af   :  { %789 = vrot.lane.b32.xlu1 %v1132_v14, %s1211_s0 }
0x1321   :  { %v790_v15 = vpop.permute.xlu1 %789 }
0x1322   :  { %v792_v16 = vmul.f32 %v1130_v6, %v790_v15 }
0x1324   :  { %794 = vrot.lane.b32.xlu0 %v792_v16, %s1212_s1 }
0x1396   :  { %v795_v17 = vpop.permute.xlu0 %794 }
0x1397   :  { %798 = vst.msk [vmem:[#allocation9 + $0x30] sm:$0xff] %vm44_vm0, %v795_v17  ;;  %1079 = vmatmul.mubr.msk.f32.vlgmr.msra.gmra.mxu1 %vm44_vm0, %v795_v17 }
0x1457   :  { %v869_v19 = vpop.f32.mrf.mxu1 }
0x1458   :  { %v873_v20 = vadd.f32 %v869_v19, %v800_v18 }
0x1459   :  { %v1080_v21 = vpop.f32.mrf.mxu1 }
0x145a   :  { %v951_v22 = vmul.f32 -1.442695, %v873_v20 }
0x145c   :  { %1133 = vpow2.f32 %v951_v22 }
0x1469   :  { %v1134_v23 = vpop.eup %1133 }
0x146a   :  { %v877_v24 = vadd.f32 1.0, %v1134_v23 }
0x146c   :  { %1135 = vrcp.f32 %v877_v24 }
0x1479   :  { %v1136_v25 = vpop.eup %1135 }
0x147a   :  { %v880_v26 = vmul.f32 2.0, %v1136_v25  ;;  %v882_v30 = vmul.f32 %v1136_v25, %v786_v13 }
0x147c   :  { %v952_v27 = vadd.f32 -1.0, %v880_v26 }
0x147e   :  { %884 = vrot.lane.b32.xlu1 %v952_v27, %s1211_s0 }
0x14f0   :  { %v885_v28 = vpop.permute.xlu1 %884 }
0x14f1   :  { %v887_v29 = vmul.f32 %v1136_v25, %v885_v28 }
0x14f3   :  { %889 = vrot.lane.b32.xlu0 %v887_v29, %s1212_s1 }
0x1565   :  { %v890_v31 = vpop.permute.xlu0 %889 }
0x1566   :  { %v892_v32 = vadd.f32 %v890_v31, %v882_v30 }
0x1568   :  { %1137 = vtanh.f32 %v892_v32 }
0x1575   :  { %v1138_v33 = vpop.eup %1137 }
0x1576   :  { %895 = vrot.lane.b32.xlu1 %v1138_v33, %s1211_s0 }
0x157a   :  { %907 = vrot.lane.b32.xlu1 %v892_v32, %s1213_s21 }
0x15e8   :  { %v896_v34 = vpop.permute.xlu1 %895 }
0x15e9   :  { %v898_v35 = vmul.f32 %v1136_v25, %v896_v34 }
0x15eb   :  { %900 = vrot.lane.b32.xlu0 %v898_v35, %s1212_s1 }
0x15ec   :  { %v908_v36 = vpop.permute.xlu1 %907 }
0x15ed   :  { %910 = vst.msk [vmem:[#allocation3] sm:$0xff] %vm44_vm0, %v908_v36 }
0x165d   :  { %v901_v37 = vpop.permute.xlu0 %900 }
0x165e   :  { %904 = vst.msk [vmem:[#allocation9 + $0x38] sm:$0xff] %vm44_vm0, %v901_v37  ;;  %905 = vst.msk [vmem:[#allocation2] sm:$0xff] %vm44_vm0, %v901_v37 }
0x165f   :  { %1190 = shalt.err (!%p1187_p0)
}
0x1660   :  { %922 = dma.vmem_to_hbm [thread:$0]  %s917_s23, 1024, %s1393_s2, [#allocation6], %s1206_s12, %s1206_s12, %s1207_s13  }
0x1661   :  { %1203 = dma.done.wait [#allocation6], 1024  }
0x1662   :  { %1204 = vsyncadd [#allocation6], 4294966272 }
0x1663   :  { %926 = vsyncpa [#allocation5], 1 }
0x1664   :  { %927 = vsyncpa [#allocation8], 1 }
0x1665   :  { %928 = vsyncpa [#allocation6], 1 }

</bundles_post_ra>
